<compile_context>
chip_gen: v7x
topology: tpu7x:2x2x1
jax: 0.10.0
libtpu: 0.0.40
codegen_flags: <defaults>
</compile_context>

<pallas_src>
import functools
import math

import jax
import jax.numpy as jnp
import numpy as np
from jax.experimental import pallas as pl
from jax.experimental.pallas import tpu as pltpu


def _interp_matrix(in_size: int, out_size: int) -> jnp.ndarray:
    """(out_size, in_size) linear-interpolation matrix matching PyTorch
    nn.Upsample(mode=linear/bilinear/trilinear, align_corners=False)."""
    scale = in_size / out_size
    out_idx = jnp.arange(out_size)
    src = jnp.maximum((out_idx.astype(jnp.float32) + 0.5) * scale - 0.5, 0.0)
    lo = jnp.minimum(jnp.floor(src).astype(jnp.int32), in_size - 1)
    hi = jnp.minimum(lo + 1, in_size - 1)
    frac = src - lo.astype(jnp.float32)
    m = jnp.zeros((out_size, in_size), dtype=jnp.float32)
    m = m.at[out_idx, lo].add(1.0 - frac)
    m = m.at[out_idx, hi].add(frac)
    return m


def _upsample_kernel(awt_ref, x_ref, o_ref, *, h: int, split_store: bool):
    """Upsample a block of whole (H, W) slices flattened along rows.

    awt_ref : (W, 2W)     W-direction interpolation matrix A_w^T.
    x_ref   : (TB*H, W)   TB input slices (slice-major rows).
    o_ref   : (TB*H, 4W)  packed output: row r = [out[2*(r%H)] | out[2*(r%H)+1]].
    """
    rows, w = x_ref.shape
    x = x_ref[...].astype(jnp.float32)

    # --- H direction (sublanes): 2-tap blend with edge clamp. ---------------
    #   out[2h]   = 0.75*x[h] + 0.25*x[h-1]   (clamped at slice row 0)
    #   out[2h+1] = 0.75*x[h] + 0.25*x[h+1]   (clamped at slice row H-1)
    if h > 1:
        # In-slice row index r % h.  Blocks are aligned to whole slices, so the
        # in-block row index works.  Computed with f32 floor math (exact while
        # rows*h < 2^22) to avoid vector integer div/rem on the VPU.
        r = jax.lax.broadcasted_iota(jnp.int32, (rows, 1), 0).astype(jnp.float32)
        q = jnp.floor((r + 0.5) * (1.0 / h))            # == r // h (exact here)
        r_in = jnp.broadcast_to(r - q * h, (rows, w))   # == r % h
        # Neighbour rows via XLU sublane rotation -- no concat/VMEM copies.
        # Wrapped rows (which may carry partial-block padding garbage) are
        # fully discarded by the jnp.where edge clamp.
        x_prev = pltpu.roll(x, 1, 0)          # x_prev[r] = x[r - 1]
        x_next = pltpu.roll(x, rows - 1, 0)   # x_next[r] = x[r + 1]
        x_even = jnp.where(r_in < 0.5, x, 0.75 * x + 0.25 * x_prev)
        x_odd = jnp.where(r_in > h - 1.5, x, 0.75 * x + 0.25 * x_next)
    else:
        # H == 1: both output rows equal the single input row.
        x_even = x
        x_odd = x

    # --- W direction (lanes): interpolate + interleave via the MXU. ---------
    awt = awt_ref[...]
    # bf16 MXU operands iff a bf16 output was requested (weights exact in bf16).
    x_even = x_even.astype(awt.dtype)
    x_odd = x_odd.astype(awt.dtype)
    y_even = jnp.dot(x_even, awt, preferred_element_type=jnp.float32)
    y_odd = jnp.dot(x_odd, awt, preferred_element_type=jnp.float32)

    if split_store:
        # 2W % 128 == 0: two unmasked, lane-dense stores.
        o_ref[:, : 2 * w] = y_even.astype(o_ref.dtype)
        o_ref[:, 2 * w :] = y_odd.astype(o_ref.dtype)
    else:
        # Small W: single fused store of the packed row.
        o_ref[...] = jnp.concatenate([y_even, y_odd], axis=-1).astype(o_ref.dtype)


def _round_up(a: int, m: int) -> int:
    return (a + m - 1) // m * m


def _vmem_limit_and_budget() -> tuple[int, int]:
    """Per-generation scoped-VMEM limit and tiling budget."""
    cap = 64 * 1024 * 1024  # conservative fallback == v7x per-core VMEM
    try:
        info = pltpu.get_tpu_info()
        for name in ("vmem_capacity_bytes", "vmem_size_bytes", "vmem_bytes"):
            v = getattr(info, name, None)
            if v:
                cap = int(v)
                break
    except Exception:
        pass
    cap = max(32 * 1024 * 1024, min(cap, 128 * 1024 * 1024))
    limit = (cap * 3) // 4     # 48 MiB on v7x, 96 MiB on v5e/v6e
    budget = (limit * 3) // 4  # headroom for compiler-internal scratch
    return limit, budget


def _pick_block_slices(b: int, h: int, w: int, in_itemsize: int,
                       out_itemsize: int, budget_bytes: int) -> int:
    """Slices per grid step from an honest VMEM model (pipeline buffers plus
    all materialized kernel temporaries, lane/sublane padded)."""
    wpad = _round_up(w, 128)
    w2pad = _round_up(2 * w, 128)
    w4pad = _round_up(4 * w, 128)
    per_slice = (
        2 * h * wpad * in_itemsize        # double-buffered input block
        + 2 * h * w4pad * out_itemsize    # double-buffered output block
        + 9 * h * wpad * 4                # x, x_prev, x_next, x_even, x_odd,
                                          # iota / masks (W-wide f32/i32 temps)
        + 2 * h * w2pad * 4               # y_even, y_odd (f32)
    )
    tb = max(1, budget_bytes // per_slice)
    tb = min(tb, b)
    # >= 4 grid steps when B permits: overlaps in-DMA / compute / out-DMA and
    # gives a balanced (even) split across the 2 TCs of a v7x megacore, while
    # not shrinking blocks more than needed on single-TC v5e/v6e.
    if b >= 4:
        tb = min(tb, pl.cdiv(b, 4))
    # Keep the (TB*H, W) block sublane-aligned (rows % 8 == 0) unless the block
    # covers the whole array.
    if tb < b and (tb * h) % 8 != 0:
        k = 8 // math.gcd(h, 8)
        tb = (tb // k) * k if tb >= k else min(k, b)
    return int(max(1, tb))


def upsample_1x2x2_trilinear(x: jnp.ndarray, out_dtype=None) -> jnp.ndarray:
    """x: (N, C, D, H, W) -> (N, C, D, 2H, 2W), trilinear, align_corners=False.

    out_dtype: optional narrower output dtype (e.g. jnp.bfloat16) to halve the
    HBM writeback of this write-bound op.  Default preserves the input dtype
    (PyTorch module semantics).
    """
    n, c, d, h, w = x.shape
    b = n * c * d
    out_dtype = x.dtype if out_dtype is None else np.dtype(out_dtype)

    # bf16 MXU operands only when the caller opted into a bf16 output.
    mxu_dtype = jnp.bfloat16 if out_dtype == jnp.bfloat16 else jnp.float32
    awt = _interp_matrix(w, 2 * w).T.astype(mxu_dtype)          # (W, 2W)

    vmem_limit, budget = _vmem_limit_and_budget()
    weight_bytes = 2 * w * _round_up(2 * w, 128) * np.dtype(mxu_dtype).itemsize
    budget = max(budget - weight_bytes, 1 << 20)
    tb = _pick_block_slices(b, h, w, x.dtype.itemsize,
                            np.dtype(out_dtype).itemsize, budget)
    rows = tb * h
    split_store = (2 * w) % 128 == 0

    x2 = x.reshape(b * h, w)
    out_packed = pl.pallas_call(
        functools.partial(_upsample_kernel, h=h, split_store=split_store),
        out_shape=jax.ShapeDtypeStruct((b * h, 4 * w), out_dtype),
        grid_spec=pltpu.PrefetchScalarGridSpec(
            num_scalar_prefetch=0,
            grid=(pl.cdiv(b, tb),),
            in_specs=[
                # Tiny interp matrix, constant block index -> DMA'd once.
                pl.BlockSpec((w, 2 * w), lambda i: (0, 0)),
                pl.BlockSpec((rows, w), lambda i: (i, 0)),
            ],
            out_specs=pl.BlockSpec((rows, 4 * w), lambda i: (i, 0)),
        ),
        compiler_params=pltpu.CompilerParams(
            dimension_semantics=("parallel",),
            vmem_limit_bytes=int(vmem_limit),
        ),
    )(awt, x2)

    # (B*H, 4W) -> (N, C, D, 2H, 2W): free row-major reinterpretation
    # (flat index (b*H + h)*4W + p*2W + wo == (b*2H + 2h + p)*2W + wo).
    return out_packed.reshape(n, c, d, 2 * h, 2 * w)


class UpBlock:
    """JAX/Pallas equivalent of deepem UpBlock: per-key trilinear upsample with
    scale_factor=(1, 2, 2).  nn.Upsample has no parameters."""

    def __init__(self, out_spec, scale_factor=(1, 2, 2), out_dtype=None):
        assert tuple(scale_factor) == (1, 2, 2), \
            "only scale_factor=(1, 2, 2) (the module default) is implemented"
        self.keys = list(out_spec.keys())
        self.out_dtype = out_dtype

    def __call__(self, x: dict) -> dict:
        return {k: upsample_1x2x2_trilinear(x[k], out_dtype=self.out_dtype)
                for k in self.keys}


def _reference_upsample(v: jnp.ndarray) -> jnp.ndarray:
    """Dense-matrix reference (PyTorch align_corners=False semantics)."""
    _, _, _, h, w = v.shape
    a_h = _interp_matrix(h, 2 * h)
    a_w = _interp_matrix(w, 2 * w)
    return jnp.einsum("ph,ncdhw,qw->ncdpq", a_h, v, a_w,
                      precision=jax.lax.Precision.HIGHEST)


if __name__ == "__main__":
    key = jax.random.PRNGKey(0)
    k1, k2, k3 = jax.random.split(key, 3)

    # Dict-of-tensors forward, NCDHW like the PyTorch module.
    out_spec = {"embedding": 4, "mask": 1}   # values unused (as in PyTorch)
    x = {
        "embedding": jax.random.normal(k1, (2, 4, 4, 16, 16), dtype=jnp.float32),
        "mask": jax.random.normal(k2, (2, 1, 4, 16, 16), dtype=jnp.float32),
    }
    block = UpBlock(out_spec)
    out = block(x)
    out = jax.tree_util.tree_map(jax.block_until_ready, out)
    for kname, v in x.items():
        ref = _reference_upsample(v)
        assert out[kname].shape == ref.shape
        assert jnp.allclose(out[kname], ref, atol=1e-5, rtol=1e-5), \
            f"mismatch for key {kname}"

    # Lane-dense split-store path (W % 64 == 0) and the optional bf16 output.
    xw = jax.random.normal(k3, (1, 2, 2, 16, 64), dtype=jnp.float32)
    ref_w = _reference_upsample(xw)
    y_f32 = jax.block_until_ready(upsample_1x2x2_trilinear(xw))
    assert y_f32.shape == ref_w.shape
    assert jnp.allclose(y_f32, ref_w, atol=1e-5, rtol=1e-5), "split-store mismatch"
    y_bf16 = jax.block_until_ready(
        upsample_1x2x2_trilinear(xw, out_dtype=jnp.bfloat16))
    assert y_bf16.dtype == jnp.bfloat16
    assert jnp.allclose(y_bf16.astype(jnp.float32), ref_w, atol=1e-1, rtol=1e-1), \
        "bf16 output mismatch"

    print("KERNEL_OK")
</pallas_src>

<mosaic_0001>
module attributes {stable_mosaic.version = 11 : i64} {
  func.func @_upsample_kernel(%arg0: i32, %arg1: memref<16x32xf32, #tpu.memory_space<vmem>>, %arg2: memref<128x16xf32, #tpu.memory_space<vmem>>, %arg3: memref<128x64xf32, #tpu.memory_space<vmem>>) attributes {dimension_semantics = [#tpu.dimension_semantics<parallel>], iteration_bounds = array<i64: 4>, scalar_prefetch = 0 : i64, scratch_operands = 0 : i64, tpu.core_type = #tpu.core_type<tc>, window_params = [{pipeline_mode = #tpu.pipeline_mode<synchronous>, transform_indices = @transform_0, window_bounds = array<i64: 16, 32>}, {transform_indices = @transform_1, window_bounds = array<i64: 128, 16>}, {transform_indices = @transform_2, window_bounds = array<i64: 128, 64>}]} {
    %c0 = arith.constant 0 : index
    %c0_0 = arith.constant 0 : index
    %0 = vector.load %arg2[%c0, %c0_0] : memref<128x16xf32, #tpu.memory_space<vmem>>, vector<128x16xf32>
    %1 = tpu.iota {dimensions = array<i32: 0>} : vector<128x1xi32>
    %2 = arith.sitofp %1 : vector<128x1xi32> to vector<128x1xf32>
    %cst = arith.constant 5.000000e-01 : f32
    %3 = vector.broadcast %cst : f32 to vector<128x1xf32>
    %4 = arith.addf %2, %3 : vector<128x1xf32>
    %cst_1 = arith.constant 6.250000e-02 : f32
    %5 = vector.broadcast %cst_1 : f32 to vector<128x1xf32>
    %6 = arith.mulf %4, %5 : vector<128x1xf32>
    %7 = math.floor %6 : vector<128x1xf32>
    %cst_2 = arith.constant 1.600000e+01 : f32
    %8 = vector.broadcast %cst_2 : f32 to vector<128x1xf32>
    %9 = arith.mulf %7, %8 : vector<128x1xf32>
    %10 = arith.subf %2, %9 : vector<128x1xf32>
    %11 = vector.shape_cast %10 : vector<128x1xf32> to vector<128x1xf32>
    %12 = vector.broadcast %11 : vector<128x1xf32> to vector<128x16xf32>
    %c1_i32 = arith.constant 1 : i32
    %13 = tpu.dynamic_rotate %0 by %c1_i32 dim 0 : vector<128x16xf32>, i32 -> vector<128x16xf32>
    %c127_i32 = arith.constant 127 : i32
    %14 = tpu.dynamic_rotate %0 by %c127_i32 dim 0 : vector<128x16xf32>, i32 -> vector<128x16xf32>
    %cst_3 = arith.constant 5.000000e-01 : f32
    %15 = vector.broadcast %cst_3 : f32 to vector<128x16xf32>
    %16 = arith.cmpf olt, %12, %15 : vector<128x16xf32>
    %cst_4 = arith.constant 7.500000e-01 : f32
    %17 = vector.broadcast %cst_4 : f32 to vector<128x16xf32>
    %18 = arith.mulf %17, %0 : vector<128x16xf32>
    %cst_5 = arith.constant 2.500000e-01 : f32
    %19 = vector.broadcast %cst_5 : f32 to vector<128x16xf32>
    %20 = arith.mulf %19, %13 : vector<128x16xf32>
    %21 = arith.addf %18, %20 : vector<128x16xf32>
    %22 = arith.select %16, %0, %21 : vector<128x16xi1>, vector<128x16xf32>
    %cst_6 = arith.constant 1.450000e+01 : f32
    %23 = vector.broadcast %cst_6 : f32 to vector<128x16xf32>
    %24 = arith.cmpf ogt, %12, %23 : vector<128x16xf32>
    %cst_7 = arith.constant 7.500000e-01 : f32
    %25 = vector.broadcast %cst_7 : f32 to vector<128x16xf32>
    %26 = arith.mulf %25, %0 : vector<128x16xf32>
    %cst_8 = arith.constant 2.500000e-01 : f32
    %27 = vector.broadcast %cst_8 : f32 to vector<128x16xf32>
    %28 = arith.mulf %27, %14 : vector<128x16xf32>
    %29 = arith.addf %26, %28 : vector<128x16xf32>
    %30 = arith.select %24, %0, %29 : vector<128x16xi1>, vector<128x16xf32>
    %c0_9 = arith.constant 0 : index
    %c0_10 = arith.constant 0 : index
    %31 = vector.load %arg1[%c0_9, %c0_10] : memref<16x32xf32, #tpu.memory_space<vmem>>, vector<16x32xf32>
    %cst_11 = arith.constant dense<0.000000e+00> : vector<128x32xf32>
    %32 = tpu.matmul %22, %31, %cst_11 {dimension_numbers = #tpu.dot_dimension_numbers<[1], [0], [0], [1], [0, 0, 1, 1], [], []>} : vector<128x16xf32>, vector<16x32xf32>, vector<128x32xf32> -> vector<128x32xf32>
    %cst_12 = arith.constant dense<0.000000e+00> : vector<128x32xf32>
    %33 = tpu.matmul %30, %31, %cst_12 {dimension_numbers = #tpu.dot_dimension_numbers<[1], [0], [0], [1], [0, 0, 1, 1], [], []>} : vector<128x16xf32>, vector<16x32xf32>, vector<128x32xf32> -> vector<128x32xf32>
    %34 = tpu.concatenate %32, %33 in 1 : vector<128x32xf32>, vector<128x32xf32> -> vector<128x64xf32>
    %c0_13 = arith.constant 0 : index
    %c0_14 = arith.constant 0 : index
    %35 = vector.load %arg3[%c0_13, %c0_14] : memref<128x64xf32, #tpu.memory_space<vmem>>, vector<128x64xf32>
    tpu.vector_store %arg3[%c0_13, %c0_14], %34 {strides = array<i32>} : memref<128x64xf32, #tpu.memory_space<vmem>>, vector<128x64xf32>,
    return
  }
  func.func @transform_0(%arg0: i32) -> (i32, i32) {
    %c0_i32 = arith.constant 0 : i32
    %c0_i32_0 = arith.constant 0 : i32
    %c0_i32_1 = arith.constant 0 : i32
    return %c0_i32, %c0_i32_0 : i32, i32
  }
  func.func @transform_1(%arg0: i32) -> (i32, i32) {
    %c0_i32 = arith.constant 0 : i32
    %c0_i32_0 = arith.constant 0 : i32
    return %arg0, %c0_i32 : i32, i32
  }
  func.func @transform_2(%arg0: i32) -> (i32, i32) {
    %c0_i32 = arith.constant 0 : i32
    %c0_i32_0 = arith.constant 0 : i32
    return %arg0, %c0_i32 : i32, i32
  }
}

</mosaic_0001>

<bundles_post_ra>
// kernel: tpu_custom_call.1
= control target key start
LH: loop header
LB: loop body
LE: loop exit
PB: predicated region body
PF: predicated region fallthrough
CT: control target
= control target key end

     0   :  { %s1205_s9 = smov 0   ;;  %s1714_s0 = inlined_call_operand.vmem [shape: f32[16,32], index: 0, kind: input, shape index: {}]   ;;  %s1715_s1 = inlined_call_operand.vmem [shape: f32[512,16], index: 1, kind: input, shape index: {}]   ;;  %s1716_s2 = inlined_call_operand.vmem [shape: f32[512,64], index: 2, kind: output, shape index: {}]  }
   0x1 LB: > { %s1029_s10 = sadd.s32 4294967295, %s1187_s9   ;;  %p1033_p0 = scmp.ge.s32.totalorder %s1187_s9, 1  ;;  %s1187_s9 = sphi %s1205_s9, %s12_s9  }
   0x2   : > { %p113_p1 = scmp.lt.s32.totalorder %s1187_s9, 5 }
   0x4   : > { %p114_p2 = pnand %p1033_p0, %p113_p1 }
   0x6   : > { %117 = sbr.rel (%p114_p2) target bundleno = 410 (0x19a), region = 28 }
   0xd   : > { %v486_v0 = vld [vmem:[%s1714_s0] sm:$0xff]  ;;  %v487_v1 = vld [vmem:[%s1714_s0 + $0x8] sm:$0xff]  ;;  %s1034_s15 = sshll.u32 %s1029_s10, 4  ;;  %v163_v2 = vlaneseq  ;;  %vm488_vm1 = vcmask 130048   ;;  %s1189_s20 = smov 32  }
   0xe   : > { %v1164_v3 = vpack.c.bf16 %v487_v1, %v486_v0  ;;  %p136_p3 = scmp.lt.s32.totalorder %s1034_s15, 63 }
   0xf   : > { %v1219_v4 = vshrl.u32 %v163_v2, 7 }
  0x10   : > { %1169 = vmatprep.subr.bf16.mxu1 %v1164_v3  ;;  %s1728_s15 = smov (!%p136_p3, %s1034_s15), 63  ;;  %1165 = vmatprep.subr.bf16.mxu0 %v1164_v3 }
  0x11   : > { %1171 = vmatpush3.bf16.msra.mxu1 %v1164_v3  ;;  %v180_v5 = vcvt.s32.f32 %v1219_v4  ;;  %vm325_vm0 = vcmp.lt.s32.totalorder %v1219_v4, 7  ;;  %v165_v6 = vadd.s32 8, %v1219_v4  ;;  %v166_v7 = vadd.s32 16, %v1219_v4  ;;  %1167 = vmatpush3.bf16.msra.mxu0 %v1164_v3  ;;  %s1035_s16 = sshll.u32 %s1728_s15, 3 }
  0x12   : > { %v1229_v8 = vadd.s32 24, %v1219_v4  ;;  %v1232_v9 = vadd.s32 32, %v1219_v4  ;;  %v1235_v10 = vadd.s32 40, %v1219_v4  ;;  %v1238_v11 = vadd.s32 48, %v1219_v4  ;;  %s1245_s19 = scalar_lea.vmem %s1715_s1, %s1035_s16  ;;  %s1661_s23 = scalar_lea.vmem %s1716_s2, %s1035_s16 }
  0x13   : > { %v196_v12 = vadd.f32 0.5, %v180_v5  ;;  %v181_v13 = vcvt.s32.f32 %v165_v6  ;;  %v182_v14 = vcvt.s32.f32 %v166_v7  ;;  %v1248_v15 = vadd.s32 56, %v1219_v4  ;;  %v1251_v16 = vld [vmem:[%s1245_s19] sm:$0xff]  ;;  %v1254_v17 = vld [vmem:[%s1245_s19 + $0x8] sm:$0xff]  ;;  %v1257_v18 = vld [vmem:[%s1245_s19 + $0x10] sm:$0xff] }
  0x14   : > { %v183_v19 = vcvt.s32.f32 %v1229_v8  ;;  %v184_v20 = vcvt.s32.f32 %v1232_v9  ;;  %v185_v21 = vcvt.s32.f32 %v1235_v10  ;;  %v186_v22 = vcvt.s32.f32 %v1238_v11  ;;  %v1269_v27 = vld [vmem:[%s1245_s19 + $0x18] sm:$0xff]  ;;  %v1286_v40 = vld [vmem:[%s1245_s19 + $0x20] sm:$0xff]  ;;  %v1300_v57 = vld [vmem:[%s1245_s19 + $0x28] sm:$0xff] }
  0x15   : > { %v212_v23 = vmul.f32 0.0625, %v196_v12  ;;  %v1717_v24 = vrot.slane %v1251_v16, 1  ;;  %v310_v25 = vrot.slane %v1254_v17, 1  ;;  %v1266_v26 = vmul.f32 0.75, %v1251_v16  ;;  %v1318_v6 = vld [vmem:[%s1245_s19 + $0x30] sm:$0xff] }
  0x16   : > { %v197_v28 = vadd.f32 0.5, %v181_v13  ;;  %v311_v29 = vrot.slane %v1257_v18, 1  ;;  %v1273_v30 = vmul.f32 0.75, %v1254_v17  ;;  %v198_v31 = vadd.f32 0.5, %v182_v14 }
  0x17   : > { %v228_v32 = vfloor.f32 %v212_v23  ;;  %v340_v33 = vsel %vm325_vm0, %v1717_v24, %v310_v25  ;;  %v312_v34 = vrot.slane %v1269_v27, 1  ;;  %v1281_v35 = vmul.f32 0.75, %v1257_v18 }
  0x18   : > { %v438_v36 = vmul.f32 0.25, %v340_v33  ;;  %v213_v37 = vmul.f32 0.0625, %v197_v28  ;;  %v339_v38 = vsel %vm325_vm0, %v310_v25, %v311_v29  ;;  %v214_v39 = vmul.f32 0.0625, %v198_v31  ;;  %v1330_v25 = vld [vmem:[%s1245_s19 + $0x38] sm:$0xff] }
  0x19   : > { %v244_v41 = vmul.f32 16.0, %v228_v32  ;;  %v439_v42 = vmul.f32 0.25, %v339_v38  ;;  %v338_v43 = vsel %vm325_vm0, %v311_v29, %v312_v34  ;;  %v199_v44 = vadd.f32 0.5, %v183_v19 }
  0x1a   : > { %v454_v45 = vadd.f32 %v438_v36, %v1266_v26  ;;  %v229_v46 = vfloor.f32 %v213_v37  ;;  %v230_v47 = vfloor.f32 %v214_v39  ;;  %v440_v48 = vmul.f32 0.25, %v338_v43 }
  0x1b   : > { %v1291_v49 = vsub.f32 %v180_v5, %v244_v41  ;;  %v455_v50 = vadd.f32 %v439_v42, %v1273_v30  ;;  %v215_v51 = vmul.f32 0.0625, %v199_v44  ;;  %v313_v52 = vrot.slane %v1286_v40, 1 }
  0x1c   : > { %v245_v53 = vmul.f32 16.0, %v229_v46  ;;  %v246_v54 = vmul.f32 16.0, %v230_v47  ;;  %v456_v55 = vadd.f32 %v440_v48, %v1281_v35  ;;  %v1297_v56 = vmul.f32 0.75, %v1269_v27 }
  0x1d   : > { %vm422_vm2 = vcmp.gt.f32.partialorder %v1291_v49, 14.5  ;;  %v231_v58 = vfloor.f32 %v215_v51  ;;  %v337_v59 = vsel %vm325_vm0, %v312_v34, %v313_v52  ;;  %v200_v60 = vadd.f32 0.5, %v184_v20 }
  0x1e   : > { %v470_v61 = vsel %vm422_vm2, %v1251_v16, %v454_v45  ;;  %v1308_v62 = vsub.f32 %v181_v13, %v245_v53  ;;  %v1310_v63 = vsub.f32 %v182_v14, %v246_v54  ;;  %v441_v0 = vmul.f32 0.25, %v337_v59  ;;  %v1353_v45 = vld [vmem:[%s1245_s19 + $0x40] sm:$0xff] }
  0x1f   : > { %1140 = vmatprep.mubr.msk.f32.mxu1 %vm488_vm1, %v470_v61  ;;  %v247_v1 = vmul.f32 16.0, %v231_v58  ;;  %v216_v2 = vmul.f32 0.0625, %v200_v60  ;;  %v314_v3 = vrot.slane %v1300_v57, 1  ;;  %v1315_v5 = vmul.f32 0.75, %v1286_v40 }
  0x20   : > { %vm423_vm3 = vcmp.gt.f32.partialorder %v1308_v62, 14.5  ;;  %vm424_vm4 = vcmp.gt.f32.partialorder %v1310_v63, 14.5  ;;  %v457_v7 = vadd.f32 %v441_v0, %v1297_v56  ;;  %v201_v8 = vadd.f32 0.5, %v185_v21 }
  0x21   : > { %v471_v12 = vsel %vm423_vm3, %v1254_v17, %v455_v50  ;;  %v472_v13 = vsel %vm424_vm4, %v1257_v18, %v456_v55  ;;  %v1327_v14 = vsub.f32 %v183_v19, %v247_v1  ;;  %v232_v23 = vfloor.f32 %v216_v2 }
  0x22   : > { %1141 = vmatmul.mubr.msk.f32.vlgmr.msra.gmra.mrb[0].mxu1 %vm488_vm1, %v471_v12  ;;  %v336_v28 = vsel %vm325_vm0, %v313_v52, %v314_v3  ;;  %v217_v29 = vmul.f32 0.0625, %v201_v8  ;;  %v315_v31 = vrot.slane %v1318_v6, 1  ;;  %v1337_v32 = vmul.f32 0.75, %v1300_v57  ;;  %v1365_v52 = vld [vmem:[%s1245_s19 + $0x48] sm:$0xff]  ;;  %v1389_v8 = vld [vmem:[%s1245_s19 + $0x50] sm:$0xff] }
  0x23   : > { %1143 = vmatprep.mubr.msk.f32.mxu1 %vm488_vm1, %v472_v13  ;;  %vm425_vm5 = vcmp.gt.f32.partialorder %v1327_v14, 14.5  ;;  %v248_v19 = vmul.f32 16.0, %v232_v23  ;;  %v442_v33 = vmul.f32 0.25, %v336_v28  ;;  %v202_v34 = vadd.f32 0.5, %v186_v22 }
  0x24   : > { %v473_v36 = vsel %vm425_vm5, %v1269_v27, %v457_v7  ;;  %v233_v37 = vfloor.f32 %v217_v29  ;;  %v335_v38 = vsel %vm325_vm0, %v314_v3, %v315_v31  ;;  %v316_v39 = vrot.slane %v1330_v25, 1 }
  0x25   : > { %v1349_v41 = vsub.f32 %v184_v20, %v248_v19  ;;  %v458_v42 = vadd.f32 %v442_v33, %v1315_v5  ;;  %v443_v43 = vmul.f32 0.25, %v335_v38  ;;  %v218_v44 = vmul.f32 0.0625, %v202_v34 }
  0x26   : > { %1144 = vmatmul.mubr.msk.f32.gmra.mrb[2].mxu1 %vm488_vm1, %v473_v36  ;;  %v249_v46 = vmul.f32 16.0, %v233_v37  ;;  %v334_v47 = vsel %vm325_vm0, %v315_v31, %v316_v39  ;;  %v1359_v48 = vmul.f32 0.75, %v1318_v6  ;;  %v187_v50 = vcvt.s32.f32 %v1248_v15 }
  0x27   : > { %vm426_vm6 = vcmp.gt.f32.partialorder %v1349_v41, 14.5  ;;  %v459_v9 = vadd.f32 %v443_v43, %v1337_v32  ;;  %v234_v20 = vfloor.f32 %v218_v44  ;;  %v444_v51 = vmul.f32 0.25, %v334_v47 }
  0x28   : > { %v474_v53 = vsel %vm426_vm6, %v1286_v40, %v458_v42  ;;  %v1370_v54 = vsub.f32 %v185_v21, %v249_v46  ;;  %v203_v55 = vadd.f32 0.5, %v187_v50  ;;  %v317_v58 = vrot.slane %v1353_v45, 1 }
  0x29   : > { %1146 = vmatprep.mubr.msk.f32.mxu1 %vm488_vm1, %v474_v53  ;;  %v250_v15 = vmul.f32 16.0, %v234_v20  ;;  %v460_v59 = vadd.f32 %v444_v51, %v1359_v48  ;;  %v1376_v60 = vmul.f32 0.75, %v1330_v25  ;;  %v172_v61 = vadd.s32 64, %v1219_v4  ;;  %v1417_v53 = vld [vmem:[%s1245_s19 + $0x60] sm:$0xff] }
  0x2a   : > { %vm427_vm7 = vcmp.gt.f32.partialorder %v1370_v54, 14.5  ;;  %v219_v0 = vmul.f32 0.0625, %v203_v55  ;;  %v333_v10 = vsel %vm325_vm0, %v316_v39, %v317_v58  ;;  %v318_v21 = vrot.slane %v1365_v52, 1 }
  0x2b   : > { %v475_v1 = vsel %vm427_vm7, %v1300_v57, %v459_v9  ;;  %v1386_v2 = vsub.f32 %v186_v22, %v250_v15  ;;  %v445_v3 = vmul.f32 0.25, %v333_v10  ;;  %v188_v7 = vcvt.s32.f32 %v172_v61  ;;  %v1400_v22 = vld [vmem:[%s1245_s19 + $0x58] sm:$0xff] }
  0x2c   : > { %1147 = vmatmul.mubr.msk.f32.gmra.mrb[4].mxu1 %vm488_vm1, %v475_v1  ;;  %v235_v12 = vfloor.f32 %v219_v0  ;;  %v332_v13 = vsel %vm325_vm0, %v317_v58, %v318_v21  ;;  %v173_v23 = vadd.s32 72, %v1219_v4  ;;  %v1397_v29 = vmul.f32 0.75, %v1353_v45 }
  0x2d   : > { %vm428_vm8 = vcmp.gt.f32.partialorder %v1386_v2, 14.5  ;;  %v204_v28 = vadd.f32 0.5, %v188_v7  ;;  %v446_v11 = vmul.f32 0.25, %v332_v13  ;;  %v319_v34 = vrot.slane %v1389_v8, 1 }
  0x2e   : > { %v476_v31 = vsel %vm428_vm8, %v1318_v6, %v460_v59  ;;  %v251_v19 = vmul.f32 16.0, %v235_v12  ;;  %v189_v33 = vcvt.s32.f32 %v173_v23  ;;  %v461_v36 = vadd.f32 %v445_v3, %v1376_v60 }
  0x2f   : > { %1149 = vmatprep.mubr.msk.f32.mxu1 %vm488_vm1, %v476_v31  ;;  %v220_v37 = vmul.f32 0.0625, %v204_v28  ;;  %v1407_v38 = vmul.f32 0.75, %v1365_v52  ;;  %v174_v39 = vadd.s32 80, %v1219_v4  ;;  %v331_v44 = vsel %vm325_vm0, %v318_v21, %v319_v34  ;;  %v1433_v28 = vld [vmem:[%s1245_s19 + $0x68] sm:$0xff] }
  0x30   : > { %v1410_v42 = vsub.f32 %v187_v50, %v251_v19  ;;  %v205_v43 = vadd.f32 0.5, %v189_v33  ;;  %v320_v46 = vrot.slane %v1400_v22, 1  ;;  %v462_v9 = vadd.f32 %v446_v11, %v1397_v29 }
  0x31   : > { %v236_v47 = vfloor.f32 %v220_v37  ;;  %v447_v20 = vmul.f32 0.25, %v331_v44  ;;  %v190_v51 = vcvt.s32.f32 %v174_v39  ;;  %v175_v58 = vadd.s32 88, %v1219_v4 }
  0x32   : > { %vm429_vm9 = vcmp.gt.f32.partialorder %v1410_v42, 14.5  ;;  %v221_v55 = vmul.f32 0.0625, %v205_v43  ;;  %v330_v50 = vsel %vm325_vm0, %v319_v34, %v320_v46  ;;  %v1425_v0 = vmul.f32 0.75, %v1389_v8 }
  0x33   : > { %v477_v15 = vsel %vm429_vm9, %v1330_v25, %v461_v36  ;;  %v252_v59 = vmul.f32 16.0, %v236_v47  ;;  %v206_v61 = vadd.f32 0.5, %v190_v51  ;;  %v463_v21 = vadd.f32 %v447_v20, %v1407_v38 }
  0x34   : > { %1150 = vmatmul.mubr.msk.f32.gmra.mrb[6].mxu1 %vm488_vm1, %v477_v15  ;;  %v237_v10 = vfloor.f32 %v221_v55  ;;  %v191_v1 = vcvt.s32.f32 %v175_v58  ;;  %v321_v3 = vrot.slane %v1417_v53, 1  ;;  %v448_v23 = vmul.f32 0.25, %v330_v50  ;;  %v1452_v15 = vld [vmem:[%s1245_s19 + $0x70] sm:$0xff] }
  0x35   : > { %v1430_v12 = vsub.f32 %v188_v7, %v252_v59  ;;  %v222_v13 = vmul.f32 0.0625, %v206_v61  ;;  %v176_v11 = vadd.s32 96, %v1219_v4  ;;  %v1439_v36 = vmul.f32 0.75, %v1400_v22 }
  0x36   : > { %v253_v31 = vmul.f32 16.0, %v237_v10  ;;  %v207_v19 = vadd.f32 0.5, %v191_v1  ;;  %v329_v34 = vsel %vm325_vm0, %v320_v46, %v321_v3  ;;  %v322_v20 = vrot.slane %v1433_v28, 1 }
  0x37   : > { %vm430_vm10 = vcmp.gt.f32.partialorder %v1430_v12, 14.5  ;;  %v238_v37 = vfloor.f32 %v222_v13  ;;  %v449_v7 = vmul.f32 0.25, %v329_v34  ;;  %v192_v39 = vcvt.s32.f32 %v176_v11 }
  0x38   : > { %v478_v43 = vsel %vm430_vm10, %v1353_v45, %v462_v9  ;;  %v1443_v44 = vsub.f32 %v189_v33, %v253_v31  ;;  %v223_v47 = vmul.f32 0.0625, %v207_v19  ;;  %v464_v46 = vadd.f32 %v448_v23, %v1425_v0 }
  0x39   : > { %1152 = vmatprep.mubr.msk.f32.mxu1 %vm488_vm1, %v478_v43  ;;  %v254_v55 = vmul.f32 16.0, %v238_v37  ;;  %v208_v50 = vadd.f32 0.5, %v192_v39  ;;  %v1449_v58 = vmul.f32 0.75, %v1417_v53  ;;  %v328_v33 = vsel %vm325_vm0, %v321_v3, %v322_v20  ;;  %v1465_v37 = vld [vmem:[%s1245_s19 + $0x78] sm:$0xff] }
  0x3a   : > { %vm431_vm11 = vcmp.gt.f32.partialorder %v1443_v44, 14.5  ;;  %v239_v9 = vfloor.f32 %v223_v47  ;;  %v177_v59 = vadd.s32 104, %v1219_v4  ;;  %v450_v23 = vmul.f32 0.25, %v328_v33 }
  0x3b   : > { %1721 = vst [vmem:[#allocation2_spill] sm:$0xff] %v1449_v58  ;;  %v479_v61 = vsel %vm431_vm11, %v1365_v52, %v463_v21  ;;  %v1459_v10 = vsub.f32 %v190_v51, %v254_v55  ;;  %v224_v13 = vmul.f32 0.0625, %v208_v50  ;;  %v465_v31 = vadd.f32 %v449_v7, %v1439_v36 }
  0x3c   : > { %1153 = vmatmul.mubr.msk.f32.gmra.mrb[8].mxu1 %vm488_vm1, %v479_v61  ;;  %v255_v11 = vmul.f32 16.0, %v239_v9  ;;  %v193_v19 = vcvt.s32.f32 %v177_v59  ;;  %v323_v34 = vrot.slane %v1452_v15, 1  ;;  %v1469_v43 = vmul.f32 0.75, %v1433_v28 }
  0x3d   : > { %vm432_vm12 = vcmp.gt.f32.partialorder %v1459_v10, 14.5  ;;  %v240_v3 = vfloor.f32 %v224_v13  ;;  %v178_v51 = vadd.s32 112, %v1219_v4  ;;  %v466_v9 = vadd.f32 %v450_v23, %v1449_v58 }
  0x3e   : > { %v480_v21 = vsel %vm432_vm12, %v1389_v8, %v464_v46  ;;  %v1473_v47 = vsub.f32 %v191_v1, %v255_v11  ;;  %v209_v55 = vadd.f32 0.5, %v193_v19  ;;  %v327_v7 = vsel %vm325_vm0, %v322_v20, %v323_v34 }
  0x3f   : > { %1155 = vmatprep.mubr.msk.f32.mxu1 %vm488_vm1, %v480_v21  ;;  %v256_v50 = vmul.f32 16.0, %v240_v3  ;;  %v194_v33 = vcvt.s32.f32 %v178_v51  ;;  %v324_v59 = vrot.slane %v1465_v37, 1  ;;  %v451_v13 = vmul.f32 0.25, %v327_v7 }
  0x40   : > { %vm433_vm13 = vcmp.gt.f32.partialorder %v1473_v47, 14.5  ;;  %v225_v61 = vmul.f32 0.0625, %v209_v55  ;;  %v179_v46 = vadd.s32 120, %v1219_v4  ;;  %v1489_v3 = vmul.f32 0.75, %v1452_v15 }
  0x41   : > { %v481_v1 = vsel %vm433_vm13, %v1400_v22, %v465_v31  ;;  %v1483_v11 = vsub.f32 %v192_v39, %v256_v50  ;;  %v210_v24 = vadd.f32 0.5, %v194_v33  ;;  %v326_v23 = vsel %vm325_vm0, %v323_v34, %v324_v59 }
  0x42   : > { %1156 = vmatmul.mubr.msk.f32.gmra.mrb[10].mxu1 %vm488_vm1, %v481_v1  ;;  %v241_v20 = vfloor.f32 %v225_v61  ;;  %v195_v51 = vcvt.s32.f32 %v179_v46  ;;  %v452_v55 = vmul.f32 0.25, %v326_v23  ;;  %v1723_v7 = vrot.slane %v1251_v16, 1 }
  0x43   : > { %1722 = vst [vmem:[#allocation3_spill] sm:$0xff] %v1483_v11  ;;  %vm434_vm14 = vcmp.gt.f32.partialorder %v1483_v11, 14.5  ;;  %v226_v21 = vmul.f32 0.0625, %v210_v24  ;;  %v467_v61 = vadd.f32 %v451_v13, %v1469_v43  ;;  %v1500_v46 = vmul.f32 0.75, %v1465_v37 }
  0x44   : > { %v341_v39 = vsel %vm325_vm0, %v324_v59, %v1723_v7  ;;  %v482_v31 = vsel %vm434_vm14, %v1417_v53, %v466_v9  ;;  %v257_v50 = vmul.f32 16.0, %v241_v20  ;;  %v211_v1 = vadd.f32 0.5, %v195_v51 }
  0x45   : > { %1158 = vmatprep.mubr.msk.f32.mxu1 %vm488_vm1, %v482_v31  ;;  %v242_v34 = vfloor.f32 %v226_v21  ;;  %v276_v24 = vrot.slane %v1251_v16, 7  ;;  %v1720_v23 = vrot.slane %v1465_v37, 7  ;;  %v453_v59 = vmul.f32 0.25, %v341_v39 }
  0x46   : > { %v1504_v58 = vsub.f32 %v193_v19, %v257_v50  ;;  %v227_v11 = vmul.f32 0.0625, %v211_v1  ;;  %vm292_vm15 = vcmp.lt.s32.totalorder %v1219_v4, 1  ;;  %v468_v13 = vadd.f32 %v452_v55, %v1489_v3 }
  0x47   : > { %v258_v9 = vmul.f32 16.0, %v242_v34  ;;  %v308_v20 = vsel %vm292_vm15, %v1720_v23, %v276_v24  ;;  %v277_v21 = vrot.slane %v1254_v17, 7  ;;  %vm342_vm2 = vcmp.lt.f32.partialorder %v1291_v49, 0.5 }
  0x48   : > { %vm435_vm0 = vcmp.gt.f32.partialorder %v1504_v58, 14.5  ;;  %v243_v7 = vfloor.f32 %v227_v11  ;;  %v374_v19 = vmul.f32 0.25, %v308_v20  ;;  %v278_v50 = vrot.slane %v1257_v18, 7 }
  0x49   : > { %v483_v39 = vsel %vm435_vm0, %v1433_v28, %v467_v61  ;;  %v1516_v31 = vsub.f32 %v194_v33, %v258_v9  ;;  %v307_v55 = vsel %vm292_vm15, %v276_v24, %v277_v21  ;;  %v469_v34 = vadd.f32 %v453_v59, %v1500_v46 }
  0x4a   : > { %1159 = vmatmul.mubr.msk.f32.gmra.mrb[12].mxu1 %vm488_vm1, %v483_v39  ;;  %v259_v1 = vmul.f32 16.0, %v243_v7  ;;  %v390_v23 = vadd.f32 %v374_v19, %v1266_v26  ;;  %v375_v11 = vmul.f32 0.25, %v307_v55  ;;  %vm343_vm4 = vcmp.lt.f32.partialorder %v1308_v62, 0.5 }
  0x4b   : > { %vm436_vm3 = vcmp.gt.f32.partialorder %v1516_v31, 14.5  ;;  %v306_v33 = vsel %vm292_vm15, %v277_v21, %v278_v50  ;;  %v279_v61 = vrot.slane %v1269_v27, 7  ;;  %vm344_vm5 = vcmp.lt.f32.partialorder %v1310_v63, 0.5 }
  0x4c   : > { %v484_v24 = vsel %vm436_vm3, %v1452_v15, %v468_v13  ;;  %v1530_v9 = vsub.f32 %v195_v51, %v259_v1  ;;  %v406_v59 = vsel %vm342_vm2, %v1251_v16, %v390_v23  ;;  %v391_v26 = vadd.f32 %v375_v11, %v1273_v30 }
  0x4d   : > { %1161 = vmatprep.mubr.msk.f32.mxu1 %vm488_vm1, %v484_v24  ;;  %1112 = vmatprep.mubr.msk.f32.mxu0 %vm488_vm1, %v406_v59  ;;  %v376_v62 = vmul.f32 0.25, %v306_v33  ;;  %v305_v20 = vsel %vm292_vm15, %v278_v50, %v279_v61  ;;  %v280_v13 = vrot.slane %v1286_v40, 7  ;;  %v281_v16 = vrot.slane %v1300_v57, 7 }
  0x4e   : > { %vm437_vm6 = vcmp.gt.f32.partialorder %v1530_v9, 14.5  ;;  %v407_v51 = vsel %vm343_vm4, %v1254_v17, %v391_v26  ;;  %v377_v49 = vmul.f32 0.25, %v305_v20  ;;  %vm345_vm7 = vcmp.lt.f32.partialorder %v1327_v14, 0.5 }
  0x4f   : > { %v485_v30 = vsel %vm437_vm6, %v1465_v37, %v469_v34  ;;  %1113 = vmatmul.mubr.msk.f32.vlgmr.msra.gmra.mrb[0].mxu0 %vm488_vm1, %v407_v51  ;;  %v392_v23 = vadd.f32 %v376_v62, %v1281_v35  ;;  %v304_v21 = vsel %vm292_vm15, %v279_v61, %v280_v13  ;;  %v303_v17 = vsel %vm292_vm15, %v280_v13, %v281_v16 }
  0x50   : > { %1162 = vmatmul.mubr.msk.f32.gmra.mrb[14].mxu1 %vm488_vm1, %v485_v30  ;;  %v393_v7 = vadd.f32 %v377_v49, %v1297_v56  ;;  %v378_v19 = vmul.f32 0.25, %v304_v21  ;;  %v282_v39 = vrot.slane %v1318_v6, 7  ;;  %vm346_vm8 = vcmp.lt.f32.partialorder %v1349_v41, 0.5 }
  0x51   : > { %v408_v55 = vsel %vm344_vm5, %v1257_v18, %v392_v23  ;;  %v379_v35 = vmul.f32 0.25, %v303_v17  ;;  %v283_v14 = vrot.slane %v1330_v25, 7  ;;  %vm347_vm9 = vcmp.lt.f32.partialorder %v1370_v54, 0.5  ;;  %v1724_v23 = vld [vmem:[#allocation3_spill] sm:$0xff] }
  0x52   : > { %1115 = vmatprep.mubr.msk.f32.mxu0 %vm488_vm1, %v408_v55  ;;  %v409_v50 = vsel %vm345_vm7, %v1269_v27, %v393_v7  ;;  %v394_v56 = vadd.f32 %v378_v19, %v1315_v5  ;;  %v302_v1 = vsel %vm292_vm15, %v281_v16, %v282_v39  ;;  %v284_v34 = vrot.slane %v1353_v45, 7 }
  0x53   : > { %1116 = vmatmul.mubr.msk.f32.gmra.mrb[2].mxu0 %vm488_vm1, %v409_v50  ;;  %v395_v18 = vadd.f32 %v379_v35, %v1337_v32  ;;  %v380_v63 = vmul.f32 0.25, %v302_v1  ;;  %v301_v41 = vsel %vm292_vm15, %v282_v39, %v283_v14  ;;  %vm348_vm10 = vcmp.lt.f32.partialorder %v1386_v2, 0.5 }
  0x54   : > { %v410_v11 = vsel %vm346_vm8, %v1286_v40, %v394_v56  ;;  %v381_v27 = vmul.f32 0.25, %v301_v41  ;;  %v285_v5 = vrot.slane %v1365_v52, 7  ;;  %vm349_vm11 = vcmp.lt.f32.partialorder %v1410_v42, 0.5 }
  0x55   : > { %1118 = vmatprep.mubr.msk.f32.mxu0 %vm488_vm1, %v410_v11  ;;  %v411_v54 = vsel %vm347_vm9, %v1300_v57, %v395_v18  ;;  %v396_v33 = vadd.f32 %v380_v63, %v1359_v48  ;;  %v300_v32 = vsel %vm292_vm15, %v283_v14, %v284_v34  ;;  %v286_v2 = vrot.slane %v1389_v8, 7 }
  0x56   : > { %v397_v61 = vadd.f32 %v381_v27, %v1376_v60  ;;  %v382_v24 = vmul.f32 0.25, %v300_v32  ;;  %v299_v40 = vsel %vm292_vm15, %v284_v34, %v285_v5  ;;  %vm350_vm12 = vcmp.lt.f32.partialorder %v1430_v12, 0.5 }
  0x57   : > { %1119 = vmatmul.mubr.msk.f32.gmra.mrb[4].mxu0 %vm488_vm1, %v411_v54  ;;  %v412_v59 = vsel %vm348_vm10, %v1318_v6, %v396_v33  ;;  %v383_v57 = vmul.f32 0.25, %v299_v40  ;;  %v287_v48 = vrot.slane %v1400_v22, 7  ;;  %vm351_vm13 = vcmp.lt.f32.partialorder %v1443_v44, 0.5 }
  0x58   : > { %1121 = vmatprep.mubr.msk.f32.mxu0 %vm488_vm1, %v412_v59  ;;  %v413_v42 = vsel %vm349_vm11, %v1330_v25, %v397_v61  ;;  %v398_v60 = vadd.f32 %v382_v24, %v1397_v29  ;;  %v298_v26 = vsel %vm292_vm15, %v285_v5, %v286_v2  ;;  %v288_v12 = vrot.slane %v1417_v53, 7 }
  0x59   : > { %v399_v62 = vadd.f32 %v383_v57, %v1407_v38  ;;  %v384_v20 = vmul.f32 0.25, %v298_v26  ;;  %v297_v6 = vsel %vm292_vm15, %v286_v2, %v287_v48  ;;  %vm352_vm14 = vcmp.lt.f32.partialorder %v1459_v10, 0.5 }
  0x5a   : > { %v414_v13 = vsel %vm350_vm12, %v1353_v45, %v398_v60  ;;  %v385_v25 = vmul.f32 0.25, %v297_v6  ;;  %v289_v29 = vrot.slane %v1433_v28, 7  ;;  %v296_v38 = vsel %vm292_vm15, %v287_v48, %v288_v12 }
  0x5b   : > { %1122 = vmatmul.mubr.msk.f32.gmra.mrb[6].mxu0 %vm488_vm1, %v413_v42  ;;  %v415_v44 = vsel %vm351_vm13, %v1365_v52, %v399_v62  ;;  %v400_v51 = vadd.f32 %v384_v20, %v1425_v0  ;;  %v386_v16 = vmul.f32 0.25, %v296_v38  ;;  %v290_v10 = vrot.slane %v1452_v15, 7  ;;  %v1725_v0 = vld [vmem:[#allocation2_spill] sm:$0xff] }
  0x5c   : > { %1124 = vmatprep.mubr.msk.f32.mxu0 %vm488_vm1, %v414_v13  ;;  %v401_v49 = vadd.f32 %v385_v25, %v1439_v36  ;;  %v295_v45 = vsel %vm292_vm15, %v288_v12, %v289_v29  ;;  %vm353_vm0 = vcmp.lt.f32.partialorder %v1473_v47, 0.5  ;;  %vm354_vm2 = vcmp.lt.f32.partialorder %v1724_v23, 0.5 }
  0x5d   : > { %v416_v30 = vsel %vm352_vm14, %v1389_v8, %v400_v51  ;;  %v387_v52 = vmul.f32 0.25, %v295_v45  ;;  %v402_v21 = vadd.f32 %v386_v16, %v1725_v0  ;;  %v294_v7 = vsel %vm292_vm15, %v289_v29, %v290_v10 }
  0x5e   : > { %v1726_v36 = vrot.slane %v1465_v37, 7  ;;  %v388_v17 = vmul.f32 0.25, %v294_v7  ;;  %v417_v8 = vsel %vm353_vm0, %v1400_v22, %v401_v49  ;;  %vm355_vm3 = vcmp.lt.f32.partialorder %v1504_v58, 0.5 }
  0x5f   : > { %1125 = vmatmul.mubr.msk.f32.gmra.mrb[8].mxu0 %vm488_vm1, %v415_v44  ;;  %v403_v47 = vadd.f32 %v387_v52, %v1469_v43  ;;  %v418_v55 = vsel %vm354_vm2, %v1417_v53, %v402_v21  ;;  %vm356_vm4 = vcmp.lt.f32.partialorder %v1516_v31, 0.5  ;;  %vm956_vm5 = vcmask 523264  }
  0x60   : > { %v293_v19 = vsel %vm292_vm15, %v290_v10, %v1726_v36  ;;  %1127 = vmatprep.mubr.msk.f32.mxu0 %vm488_vm1, %v416_v30  ;;  %v404_v35 = vadd.f32 %v388_v17, %v1489_v3  ;;  %vm357_vm15 = vcmp.lt.f32.partialorder %v1530_v9, 0.5 }
  0x61   : > { %v389_v39 = vmul.f32 0.25, %v293_v19  ;;  %v419_v4 = vsel %vm355_vm3, %v1433_v28, %v403_v47 }
  0x62   : > { %v420_v22 = vsel %vm356_vm4, %v1452_v15, %v404_v35 }
  0x63   : > { %1128 = vmatmul.mubr.msk.f32.gmra.mrb[10].mxu0 %vm488_vm1, %v417_v8  ;;  %v405_v14 = vadd.f32 %v389_v39, %v1500_v46 }
  0x64   : > { %1130 = vmatprep.mubr.msk.f32.mxu0 %vm488_vm1, %v418_v55 }
  0x65   : > { %v421_v53 = vsel %vm357_vm15, %v1465_v37, %v405_v14 }
  0x67   : > { %1131 = vmatmul.mubr.msk.f32.gmra.mrb[12].mxu0 %vm488_vm1, %v419_v4 }
  0x68   : > { %1133 = vmatprep.mubr.msk.f32.mxu0 %vm488_vm1, %v420_v22 }
  0x6b   : > { %1134 = vmatmul.mubr.msk.f32.gmra.mrb[14].mxu0 %vm488_vm1, %v421_v53  ;;  %vm939_vm1 = vcmask 261120  }
  0xf5   : > { %v1142_v58 = vpop.f32.mrb[0].mxu1 }
  0xf6   : > { %893 = vrot.lane.b32.xlu0 %v1142_v58, %s1189_s20  ;;  %v796_v43 = vpop.f32.mrb[1].mxu1 }
  0xf9   : > { %v1145_v28 = vpop.f32.mrb[2].mxu1 }
  0xfa   : > { %891 = vrot.lane.b32.xlu0 %v796_v43, %s1189_s20  ;;  %897 = vrot.lane.b32.xlu1 %v1145_v28, %s1189_s20  ;;  %v806_v15 = vpop.f32.mrb[3].mxu1 }
  0xfe   : > { %895 = vrot.lane.b32.xlu1 %v806_v15, %s1189_s20 }
  0xff   : > { %v1148_v3 = vpop.f32.mrb[4].mxu1 }
 0x100   : > { %v816_v46 = vpop.f32.mrb[5].mxu1 }
 0x101   : > { %899 = vrot.lane.b32.xlu0 %v816_v46, %s1189_s20 }
 0x102   : > { %901 = vrot.lane.b32.xlu1 %v1148_v3, %s1189_s20 }
 0x107   : > { %v1151_v37 = vpop.f32.mrb[6].mxu1 }
 0x108   : > { %v826_v31 = vpop.f32.mrb[7].mxu1  ;;  %905 = vrot.lane.b32.xlu1 %v1151_v37, %s1189_s20 }
 0x109   : > { %903 = vrot.lane.b32.xlu0 %v826_v31, %s1189_s20 }
 0x10f   : > { %v1154_v9 = vpop.f32.mrb[8].mxu1 }
 0x110   : > { %v836_v50 = vpop.f32.mrb[9].mxu1  ;;  %909 = vrot.lane.b32.xlu1 %v1154_v9, %s1189_s20 }
 0x111   : > { %907 = vrot.lane.b32.xlu0 %v836_v50, %s1189_s20 }
 0x115   : > { %v1157_v56 = vpop.f32.mrb[10].mxu1 }
 0x116   : > { %v846_v1 = vpop.f32.mrb[11].mxu1  ;;  %913 = vrot.lane.b32.xlu1 %v1157_v56, %s1189_s20 }
 0x117   : > { %911 = vrot.lane.b32.xlu0 %v846_v1, %s1189_s20 }
 0x11d   : > { %v1160_v18 = vpop.f32.mrb[12].mxu1 }
 0x11e   : > { %v856_v63 = vpop.f32.mrb[13].mxu1  ;;  %917 = vrot.lane.b32.xlu1 %v1160_v18, %s1189_s20 }
 0x11f   : > { %915 = vrot.lane.b32.xlu0 %v856_v63, %s1189_s20 }
 0x122   : > { %v1114_v41 = vpop.f32.mrb[0].mxu0 }
 0x123   : > { %v1163_v34 = vpop.f32.mrb[14].mxu1  ;;  %v603_v11 = vpop.f32.mrb[1].mxu0 }
 0x124   : > { %v866_v27 = vpop.f32.mrb[15].mxu1  ;;  %921 = vrot.lane.b32.xlu1 %v1163_v34, %s1189_s20 }
 0x125   : > { %919 = vrot.lane.b32.xlu0 %v866_v27, %s1189_s20 }
 0x126   : > { %v1117_v5 = vpop.f32.mrb[2].mxu0 }
 0x127   : > { %v613_v54 = vpop.f32.mrb[3].mxu0 }
 0x12a   : > { %v1120_v33 = vpop.f32.mrb[4].mxu0 }
 0x12b   : > { %v623_v32 = vpop.f32.mrb[5].mxu0 }
 0x12e   : > { %v1123_v61 = vpop.f32.mrb[6].mxu0 }
 0x12f   : > { %v633_v24 = vpop.f32.mrb[7].mxu0 }
 0x132   : > { %v1126_v40 = vpop.f32.mrb[8].mxu0 }
 0x133   : > { %v643_v2 = vpop.f32.mrb[9].mxu0 }
 0x136   : > { %v1129_v59 = vpop.f32.mrb[10].mxu0 }
 0x137   : > { %v653_v57 = vpop.f32.mrb[11].mxu0 }
 0x13a   : > { %v1132_v48 = vpop.f32.mrb[12].mxu0 }
 0x13b   : > { %v663_v42 = vpop.f32.mrb[13].mxu0 }
 0x13e   : > { %v1135_v60 = vpop.f32.mrb[14].mxu0 }
 0x13f   : > { %v673_v26 = vpop.f32.mrb[15].mxu0 }
 0x168   : > { %v894_v62 = vpop.permute.xlu0 %893 }
 0x169   : > { %v941_v20 = vsel %vm939_vm1, %v1114_v41, %v894_v62 }
 0x16a   : > { %958 = vst.msk [vmem:[%s1661_s23 + $0x8] sm:$0xff] %vm956_vm5, %v941_v20 }
 0x16c   : > { %v892_v6 = vpop.permute.xlu0 %891  ;;  %v898_v12 = vpop.permute.xlu1 %897 }
 0x16d   : > { %v940_v13 = vsel %vm939_vm1, %v603_v11, %v892_v6  ;;  %v943_v25 = vsel %vm939_vm1, %v1117_v5, %v898_v12 }
 0x16e   : > { %957 = vst.msk [vmem:[%s1661_s23] sm:$0xff] %vm956_vm5, %v940_v13  ;;  %960 = vst.msk [vmem:[%s1661_s23 + $0x18] sm:$0xff] %vm956_vm5, %v943_v25 }
 0x170   : > { %v896_v29 = vpop.permute.xlu1 %895 }
 0x171   : > { %v942_v44 = vsel %vm939_vm1, %v613_v54, %v896_v29 }
 0x172   : > { %959 = vst.msk [vmem:[%s1661_s23 + $0x10] sm:$0xff] %vm956_vm5, %v942_v44 }
 0x173   : > { %v900_v51 = vpop.permute.xlu0 %899 }
 0x174   : > { %v944_v38 = vsel %vm939_vm1, %v623_v32, %v900_v51  ;;  %v902_v49 = vpop.permute.xlu1 %901 }
 0x175   : > { %961 = vst.msk [vmem:[%s1661_s23 + $0x20] sm:$0xff] %vm956_vm5, %v944_v38  ;;  %v945_v16 = vsel %vm939_vm1, %v1120_v33, %v902_v49 }
 0x176   : > { %962 = vst.msk [vmem:[%s1661_s23 + $0x28] sm:$0xff] %vm956_vm5, %v945_v16 }
 0x17a   : > { %v906_v45 = vpop.permute.xlu1 %905 }
 0x17b   : > { %v904_v10 = vpop.permute.xlu0 %903  ;;  %v947_v30 = vsel %vm939_vm1, %v1123_v61, %v906_v45 }
 0x17c   : > { %v946_v52 = vsel %vm939_vm1, %v633_v24, %v904_v10  ;;  %964 = vst.msk [vmem:[%s1661_s23 + $0x38] sm:$0xff] %vm956_vm5, %v947_v30 }
 0x17d   : > { %963 = vst.msk [vmem:[%s1661_s23 + $0x30] sm:$0xff] %vm956_vm5, %v946_v52 }
 0x182   : > { %v910_v23 = vpop.permute.xlu1 %909 }
 0x183   : > { %v908_v0 = vpop.permute.xlu0 %907  ;;  %v949_v21 = vsel %vm939_vm1, %v1126_v40, %v910_v23 }
 0x184   : > { %v948_v7 = vsel %vm939_vm1, %v643_v2, %v908_v0  ;;  %966 = vst.msk [vmem:[%s1661_s23 + $0x48] sm:$0xff] %vm956_vm5, %v949_v21 }
 0x185   : > { %965 = vst.msk [vmem:[%s1661_s23 + $0x40] sm:$0xff] %vm956_vm5, %v948_v7 }
 0x188   : > { %v914_v36 = vpop.permute.xlu1 %913 }
 0x189   : > { %v912_v19 = vpop.permute.xlu0 %911  ;;  %v951_v17 = vsel %vm939_vm1, %v1129_v59, %v914_v36 }
 0x18a   : > { %v950_v8 = vsel %vm939_vm1, %v653_v57, %v912_v19  ;;  %968 = vst.msk [vmem:[%s1661_s23 + $0x58] sm:$0xff] %vm956_vm5, %v951_v17 }
 0x18b   : > { %967 = vst.msk [vmem:[%s1661_s23 + $0x50] sm:$0xff] %vm956_vm5, %v950_v8 }
 0x190   : > { %v918_v47 = vpop.permute.xlu1 %917 }
 0x191   : > { %v916_v39 = vpop.permute.xlu0 %915  ;;  %v953_v55 = vsel %vm939_vm1, %v1132_v48, %v918_v47 }
 0x192   : > { %v952_v35 = vsel %vm939_vm1, %v663_v42, %v916_v39  ;;  %970 = vst.msk [vmem:[%s1661_s23 + $0x68] sm:$0xff] %vm956_vm5, %v953_v55 }
 0x193   : > { %969 = vst.msk [vmem:[%s1661_s23 + $0x60] sm:$0xff] %vm956_vm5, %v952_v35 }
 0x196   : > { %v922_v4 = vpop.permute.xlu1 %921 }
 0x197   : > { %v920_v14 = vpop.permute.xlu0 %919  ;;  %v955_v22 = vsel %vm939_vm1, %v1135_v60, %v922_v4 }
 0x198   : > { %v954_v53 = vsel %vm939_vm1, %v673_v26, %v920_v14  ;;  %972 = vst.msk [vmem:[%s1661_s23 + $0x78] sm:$0xff] %vm956_vm5, %v955_v22 }
 0x199   : > { %971 = vst.msk [vmem:[%s1661_s23 + $0x70] sm:$0xff] %vm956_vm5, %v954_v53 }
 0x19a PF: > { %s12_s9 = sadd.s32 1, %s1187_s9  }
 0x19b   : > { %p9_p4 = scmp.ge.s32.totalorder %s12_s9, 6  }
 0x19d   :  { %11 = sbr.rel (!%p9_p4) target bundleno = 1 (0x1), region = 58 }

</bundles_post_ra>
